<compile_context>
chip_gen: v7x
topology: tpu7x:2x2x1
jax: 0.10.0
libtpu: 0.0.40
codegen_flags: <defaults>
</compile_context>

<pallas_src>
import functools

import jax
import jax.numpy as jnp
from jax.experimental import pallas as pl
from jax.experimental.pallas import tpu as pltpu

LANE = 128   # vreg lane width
SUBLANE = 8  # vreg sublane width


def _round_up(n, m):
    return ((n + m - 1) // m) * m


def mlp_kernel(x_ref, w1_ref, b1_ref, w2_ref, b2_ref, o_ref):
    # hidden = relu(x @ W1 + b1): bf16 MXU matmul, f32 accumulate, f32 VPU
    # bias-add / ReLU (hidden under the MXU result drain).
    h = jnp.dot(x_ref[...], w1_ref[...], preferred_element_type=jnp.float32)
    h = jnp.maximum(h + b1_ref[...], 0.0)
    # predict = hidden @ W2 + b2: downcast h to bf16 only for the MXU.
    out = jnp.dot(h.astype(jnp.bfloat16), w2_ref[...],
                  preferred_element_type=jnp.float32)
    o_ref[...] = (out + b2_ref[...]).astype(o_ref.dtype)


@functools.partial(jax.jit, static_argnames=("max_tile_rows",))
def net_forward(x, w1, b1, w2, b2, *, max_tile_rows=512):
    """Fused Linear->ReLU->Linear forward. x: (B, F) f32. Returns (B, O) f32."""
    B, F = x.shape
    H = w1.shape[1]
    O = w2.shape[1]

    # Lane-dense padding of the hidden / output feature dims (zero columns,
    # sliced off at the end). In production the weights would be stored
    # pre-padded once instead of padded per call.
    Hp = _round_up(H, LANE)
    Op = _round_up(O, LANE)

    # Batch tile: as large as practical (review: >=512 rows reaches ~85% of
    # HBM roofline), padded so the grid divides evenly and rows are
    # sublane-aligned.
    TB = min(max_tile_rows, _round_up(B, SUBLANE))
    Bp = _round_up(B, TB)

    # Pad + cast MXU operands to bf16; biases stay f32.
    xp = jnp.zeros((Bp, F), jnp.bfloat16).at[:B, :].set(x.astype(jnp.bfloat16))
    w1p = jnp.zeros((F, Hp), jnp.bfloat16).at[:, :H].set(w1.astype(jnp.bfloat16))
    w2p = jnp.zeros((Hp, Op), jnp.bfloat16).at[:H, :O].set(w2.astype(jnp.bfloat16))
    b1p = jnp.zeros((1, Hp), jnp.float32).at[:, :H].set(b1)
    b2p = jnp.zeros((1, Op), jnp.float32).at[:, :O].set(b2)

    grid = (Bp // TB,)

    out_padded = pl.pallas_call(
        mlp_kernel,
        out_shape=jax.ShapeDtypeStruct((Bp, Op), jnp.float32),
        grid_spec=pltpu.PrefetchScalarGridSpec(
            num_scalar_prefetch=0,
            grid=grid,
            in_specs=[
                pl.BlockSpec((TB, F), lambda i: (i, 0)),    # x tile (pipelined)
                pl.BlockSpec((F, Hp), lambda i: (0, 0)),    # W1 resident
                pl.BlockSpec((1, Hp), lambda i: (0, 0)),    # b1 resident
                pl.BlockSpec((Hp, Op), lambda i: (0, 0)),   # W2 resident
                pl.BlockSpec((1, Op), lambda i: (0, 0)),    # b2 resident
            ],
            out_specs=pl.BlockSpec((TB, Op), lambda i: (i, 0)),
        ),
        compiler_params=pltpu.CompilerParams(
            dimension_semantics=("parallel",),  # shard batch tiles on v7x 2xTC
        ),
    )(xp, w1p, b1p, w2p, b2p)

    return out_padded[:B, :O]


def init_params(key, n_feature, n_hidden, n_output):
    # Deterministic init mimicking torch.nn.Linear (uniform +-1/sqrt(fan_in)).
    k1, k2, k3, k4 = jax.random.split(key, 4)
    bound1 = 1.0 / jnp.sqrt(jnp.float32(n_feature))
    bound2 = 1.0 / jnp.sqrt(jnp.float32(n_hidden))
    w1 = jax.random.uniform(k1, (n_feature, n_hidden), jnp.float32, -bound1, bound1)
    b1 = jax.random.uniform(k2, (1, n_hidden), jnp.float32, -bound1, bound1)
    w2 = jax.random.uniform(k3, (n_hidden, n_output), jnp.float32, -bound2, bound2)
    b2 = jax.random.uniform(k4, (1, n_output), jnp.float32, -bound2, bound2)
    return w1, b1, w2, b2


if __name__ == "__main__":
    n_feature, n_hidden, n_output = 16, 32, 8
    batch = 8

    key = jax.random.PRNGKey(0)
    kx, kp = jax.random.split(key)
    x = jax.random.normal(kx, (batch, n_feature), jnp.float32)
    w1, b1, w2, b2 = init_params(kp, n_feature, n_hidden, n_output)

    out = net_forward(x, w1, b1, w2, b2)
    out = jax.block_until_ready(out)

    # Reference checks in plain JAX (same math as the PyTorch forward).
    # 1) Tight check against a reference that mirrors the kernel's bf16 MXU /
    #    f32 accumulate numerics.
    xb, w1b, w2b = (a.astype(jnp.bfloat16) for a in (x, w1, w2))
    h_ref = jnp.maximum(
        jnp.dot(xb, w1b, preferred_element_type=jnp.float32) + b1, 0.0)
    ref_bf16 = jnp.dot(h_ref.astype(jnp.bfloat16), w2b,
                       preferred_element_type=jnp.float32) + b2
    # 2) Loose check against the full-f32 PyTorch-equivalent math.
    ref_f32 = jnp.maximum(x @ w1 + b1, 0.0) @ w2 + b2

    assert out.shape == (batch, n_output)
    assert jnp.allclose(out, ref_bf16, atol=1e-5, rtol=1e-5)
    assert jnp.allclose(out, ref_f32, atol=5e-2, rtol=5e-2)

    print("KERNEL_OK")
</pallas_src>

<mosaic_0001>
module attributes {stable_mosaic.version = 11 : i64} {
  func.func @mlp_kernel(%arg0: i32, %arg1: memref<8x16xbf16, #tpu.memory_space<vmem>>, %arg2: memref<16x128xbf16, #tpu.memory_space<vmem>>, %arg3: memref<1x128xf32, #tpu.memory_space<vmem>>, %arg4: memref<128x128xbf16, #tpu.memory_space<vmem>>, %arg5: memref<1x128xf32, #tpu.memory_space<vmem>>, %arg6: memref<8x128xf32, #tpu.memory_space<vmem>>) attributes {dimension_semantics = [#tpu.dimension_semantics<parallel>], iteration_bounds = array<i64: 1>, scalar_prefetch = 0 : i64, scratch_operands = 0 : i64, tpu.core_type = #tpu.core_type<tc>, window_params = [{transform_indices = @transform_0, window_bounds = array<i64: 8, 16>}, {pipeline_mode = #tpu.pipeline_mode<synchronous>, transform_indices = @transform_1, window_bounds = array<i64: 16, 128>}, {pipeline_mode = #tpu.pipeline_mode<synchronous>, transform_indices = @transform_2, window_bounds = array<i64: 1, 128>}, {pipeline_mode = #tpu.pipeline_mode<synchronous>, transform_indices = @transform_3, window_bounds = array<i64: 128, 128>}, {pipeline_mode = #tpu.pipeline_mode<synchronous>, transform_indices = @transform_4, window_bounds = array<i64: 1, 128>}, {transform_indices = @transform_5, window_bounds = array<i64: 8, 128>}]} {
    %c0 = arith.constant 0 : index
    %c0_0 = arith.constant 0 : index
    %0 = vector.load %arg1[%c0, %c0_0] : memref<8x16xbf16, #tpu.memory_space<vmem>>, vector<8x16xbf16>
    %c0_1 = arith.constant 0 : index
    %c0_2 = arith.constant 0 : index
    %1 = vector.load %arg2[%c0_1, %c0_2] : memref<16x128xbf16, #tpu.memory_space<vmem>>, vector<16x128xbf16>
    %cst = arith.constant dense<0.000000e+00> : vector<8x128xf32>
    %2 = tpu.matmul %0, %1, %cst {dimension_numbers = #tpu.dot_dimension_numbers<[1], [0], [0], [1], [0, 0, 1, 1], [], []>} : vector<8x16xbf16>, vector<16x128xbf16>, vector<8x128xf32> -> vector<8x128xf32>
    %c0_3 = arith.constant 0 : index
    %c0_4 = arith.constant 0 : index
    %3 = vector.load %arg3[%c0_3, %c0_4] : memref<1x128xf32, #tpu.memory_space<vmem>>, vector<1x128xf32>
    %4 = vector.broadcast %3 : vector<1x128xf32> to vector<8x128xf32>
    %5 = arith.addf %2, %4 : vector<8x128xf32>
    %cst_5 = arith.constant 0.000000e+00 : f32
    %6 = vector.broadcast %cst_5 : f32 to vector<8x128xf32>
    %7 = arith.maximumf %5, %6 : vector<8x128xf32>
    %8 = arith.truncf %7 : vector<8x128xf32> to vector<8x128xbf16>
    %c0_6 = arith.constant 0 : index
    %c0_7 = arith.constant 0 : index
    %9 = vector.load %arg4[%c0_6, %c0_7] : memref<128x128xbf16, #tpu.memory_space<vmem>>, vector<128x128xbf16>
    %cst_8 = arith.constant dense<0.000000e+00> : vector<8x128xf32>
    %10 = tpu.matmul %8, %9, %cst_8 {dimension_numbers = #tpu.dot_dimension_numbers<[1], [0], [0], [1], [0, 0, 1, 1], [], []>} : vector<8x128xbf16>, vector<128x128xbf16>, vector<8x128xf32> -> vector<8x128xf32>
    %c0_9 = arith.constant 0 : index
    %c0_10 = arith.constant 0 : index
    %11 = vector.load %arg5[%c0_9, %c0_10] : memref<1x128xf32, #tpu.memory_space<vmem>>, vector<1x128xf32>
    %12 = vector.broadcast %11 : vector<1x128xf32> to vector<8x128xf32>
    %13 = arith.addf %10, %12 : vector<8x128xf32>
    %c0_11 = arith.constant 0 : index
    %c0_12 = arith.constant 0 : index
    %14 = vector.load %arg6[%c0_11, %c0_12] : memref<8x128xf32, #tpu.memory_space<vmem>>, vector<8x128xf32>
    tpu.vector_store %arg6[%c0_11, %c0_12], %13 {strides = array<i32>} : memref<8x128xf32, #tpu.memory_space<vmem>>, vector<8x128xf32>,
    return
  }
  func.func @transform_0(%arg0: i32) -> (i32, i32) {
    %c0_i32 = arith.constant 0 : i32
    %c0_i32_0 = arith.constant 0 : i32
    return %arg0, %c0_i32 : i32, i32
  }
  func.func @transform_1(%arg0: i32) -> (i32, i32) {
    %c0_i32 = arith.constant 0 : i32
    %c0_i32_0 = arith.constant 0 : i32
    %c0_i32_1 = arith.constant 0 : i32
    return %c0_i32, %c0_i32_0 : i32, i32
  }
  func.func @transform_2(%arg0: i32) -> (i32, i32) {
    %c0_i32 = arith.constant 0 : i32
    %c0_i32_0 = arith.constant 0 : i32
    %c0_i32_1 = arith.constant 0 : i32
    return %c0_i32, %c0_i32_0 : i32, i32
  }
  func.func @transform_3(%arg0: i32) -> (i32, i32) {
    %c0_i32 = arith.constant 0 : i32
    %c0_i32_0 = arith.constant 0 : i32
    %c0_i32_1 = arith.constant 0 : i32
    return %c0_i32, %c0_i32_0 : i32, i32
  }
  func.func @transform_4(%arg0: i32) -> (i32, i32) {
    %c0_i32 = arith.constant 0 : i32
    %c0_i32_0 = arith.constant 0 : i32
    %c0_i32_1 = arith.constant 0 : i32
    return %c0_i32, %c0_i32_0 : i32, i32
  }
  func.func @transform_5(%arg0: i32) -> (i32, i32) {
    %c0_i32 = arith.constant 0 : i32
    %c0_i32_0 = arith.constant 0 : i32
    return %arg0, %c0_i32 : i32, i32
  }
}

</mosaic_0001>

<bundles_post_ra>
// kernel: net_forward.1
= control target key start
LH: loop header
LB: loop body
LE: loop exit
PB: predicated region body
PF: predicated region fallthrough
CT: control target
= control target key end

     0   :  { %v295_v1 = vmov 0.0   ;;  %vm296_vm0 = vmmov 0   ;;  %vm38_vm1 = vcmask 130048   ;;  %s376_s0 = inlined_call_operand.vmem [shape: bf16[8,16], index: 0, kind: input, shape index: {}]   ;;  %s377_s1 = inlined_call_operand.vmem [shape: bf16[16,128], index: 1, kind: input, shape index: {}]   ;;  %s378_s2 = inlined_call_operand.vmem [shape: f32[1,128], index: 2, kind: input, shape index: {}]   ;;  %s379_s3 = inlined_call_operand.vmem [shape: bf16[128,128], index: 3, kind: input, shape index: {}]   ;;  %s380_s4 = inlined_call_operand.vmem [shape: f32[1,128], index: 4, kind: input, shape index: {}]   ;;  %s381_s5 = inlined_call_operand.hbm [shape: f32[8,128], index: 5, kind: output, shape index: {}]  }
   0x1   :  { %v262_v0 = vld [vmem:[%s377_s1] sm:$0xff]   ;;  %233 = vmatprep.subr.bf16.mxu0 %v295_v1  ;;  %239 = vmatprep.subr.bf16.mxu1 %v295_v1  ;;  %v264_v4 = vld [vmem:[%s379_s3 + $0x8] sm:$0xff]   ;;  %v265_v5 = vld [vmem:[%s379_s3 + $0x10] sm:$0xff]  }
   0x2   :  { %v22_v2 = vld [vmem:[%s376_s0] sm:$0xf]  ;;  %234 = vmatpush3.bf16.msra.mxu0 %v262_v0  ;;  %235 = vmatprep.mubr.msk.bf16.mxu0 %vm296_vm0, %v295_v1 }
   0x3   :  { %v263_v3 = vld [vmem:[%s379_s3] sm:$0xff]   ;;  %255 = vmatprep.mubr.msk.bf16.mxu1 %vm296_vm0, %v295_v1 }
   0x4   :  { %240 = vmatpush3.bf16.msra.mxu1 %v263_v3 }
   0x5   :  { %236 = vmatmul.mubr.msk.bf16.vlgmr.msra.gmra.mrb[0].mxu0 %vm38_vm1, %v22_v2  ;;  %241 = vmatprep.subr.bf16.mxu1 %v295_v1 }
   0x8   :  { %242 = vmatpush3.bf16.msra.mxu1 %v264_v4 }
   0x9   :  { %243 = vmatprep.subr.bf16.mxu1 %v295_v1 }
   0xa   :  { %10 = vsyncpa [#allocation3], 0  ;;  %v266_v6 = vld [vmem:[%s379_s3 + $0x18] sm:$0xff]   ;;  %v267_v7 = vld [vmem:[%s379_s3 + $0x20] sm:$0xff]   ;;  %s297_s15 = smov [#allocation2]  }
   0xb   :  { %v268_v8 = vld [vmem:[%s379_s3 + $0x28] sm:$0xff]   ;;  %v269_v9 = vld [vmem:[%s379_s3 + $0x30] sm:$0xff]   ;;  %v270_v10 = vld [vmem:[%s379_s3 + $0x38] sm:$0xff]   ;;  %s202_s16 = sshll.u32 %s297_s15, 4  ;;  %s203_s16 = int_to_ptr.vmem [resolvable:$true] %s202_s16 }
   0xc   :  { %244 = vmatpush3.bf16.msra.mxu1 %v265_v5  ;;  %v210_v11 = vld [vmem:[%s378_s2] ss:$0 sm:$0xff]  ;;  %s271_s2 = scalar_lea.vmem %s203_s16, 128  ;;  %p276_p1 = scmp.lt.s32.totalorder %s203_s16, %s203_s16 }
   0xd   :  { %245 = vmatprep.subr.bf16.mxu1 %v295_v1  ;;  %v213_v19 = vld [vmem:[%s380_s4] ss:$0 sm:$0xff]  ;;  %p272_p0 = scmp.ne.s32.totalorder %s203_s16, %s271_s2  ;;  %p277_p2 = scmp.lt.s32.totalorder %s271_s2, %s271_s2 }
   0xf   :  { %p278_p3 = por %p277_p2, %p276_p1 }
  0x10   :  { %246 = vmatpush3.bf16.msra.mxu1 %v266_v6 }
  0x11   :  { %247 = vmatprep.subr.bf16.mxu1 %v295_v1  ;;  %p279_p4 = pnand %p278_p3, %p272_p0 }
  0x14   :  { %248 = vmatpush3.bf16.msra.mxu1 %v267_v7 }
  0x15   :  { %249 = vmatprep.subr.bf16.mxu1 %v295_v1 }
  0x18   :  { %250 = vmatpush3.bf16.msra.mxu1 %v268_v8 }
  0x19   :  { %251 = vmatprep.subr.bf16.mxu1 %v295_v1 }
  0x1c   :  { %252 = vmatpush3.bf16.msra.mxu1 %v269_v9 }
  0x1d   :  { %253 = vmatprep.subr.bf16.mxu1 %v295_v1 }
  0x20   :  { %254 = vmatpush3.bf16.msra.mxu1 %v270_v10 }
  0xd8   :  { %v76_v12 = vpop.f32.mrb[0].mxu0 }
  0xd9   :  { %v77_v13 = vadd.f32 %v210_v11, %v76_v12  ;;  %v237_v14 = vpop.f32.mrb[1].mxu0 }
  0xda   :  { %v79_v15 = vpop.f32.mrb[2].mxu0 }
  0xdb   :  { %v82_v16 = vmax.f32 %v77_v13, 0.0  ;;  %v238_v17 = vpop.f32.mrb[3].mxu0 }
  0xdd   :  { %v83_v18 = vpack.c.bf16 %v82_v16, %v82_v16 }
  0xdf   :  { %256 = vmatmul.mubr.bf16.vlgmr.msra.gmra.mrb[0].mxu1 %v83_v18 }
 0x1b2   :  { %v189_v20 = vpop.f32.mrb[0].mxu1 }
 0x1b3   :  { %v190_v21 = vadd.f32 %v213_v19, %v189_v20  ;;  %v257_v22 = vpop.f32.mrb[1].mxu1 }
 0x1b4   :  { %v192_v23 = vpop.f32.mrb[2].mxu1 }
 0x1b5   :  { %195 = vst [vmem:[#allocation2] sm:$0xff] %v190_v21  ;;  %v258_v24 = vpop.f32.mrb[3].mxu1 }
 0x1b6   :  { %282 = shalt.err (!%p279_p4)
}
 0x1b7   :  { %s283_s4 = scalar_lea.hbm %s381_s5, 128 }
 0x1b8   :  { %p284_p5 = scmp.ne.s32.totalorder %s381_s5, %s283_s4  ;;  %p287_p6 = scmp.lt.u32.totalorder %s283_s4, %s381_s5 }
 0x1ba   :  { %p289_p7 = pnand %p287_p6, %p284_p5 }
 0x1bc   :  { %292 = shalt.err (!%p289_p7)
}
 0x1bd   :  { %205 = dma.vmem_to_hbm [thread:$0]  %s203_s16, 128, %s381_s5, [#allocation3]  }
 0x1be   :  { %293 = dma.done.wait [#allocation3], 128  }
 0x1bf   :  { %294 = vsyncadd [#allocation3], 4294967168 }
 0x1c0   :  { %209 = vsyncpa [#allocation3], 1 }

</bundles_post_ra>
